<compile_context>
chip_gen: v7x
topology: tpu7x:2x2x1
jax: 0.10.0
libtpu: 0.0.40
codegen_flags: <defaults>
</compile_context>

<pallas_src>
import jax
import jax.numpy as jnp
from jax.experimental import pallas as pl
from jax.experimental.pallas import tpu as pltpu

IGNORE_INDEX = -100


def _make_ce_kernel(v_total: int, chunk: int, num_chunks: int):
    """Build the vocab-chunked online-LSE cross-entropy kernel."""
    mask_cols = (v_total % chunk) != 0  # static: only the ragged last chunk needs it

    def kernel(logits_ref, labels_ref, out_ref, m_sc, l_sc, xl_sc):
        # logits_ref: (TM, CHUNK) input dtype; labels_ref: (TM, 1) int32
        # out_ref:    (1, 1) f32 per-row-tile partial NLL sum
        # scratch:    m_sc / l_sc / xl_sc are (TM, 1) f32 running accumulators
        j = pl.program_id(1)  # vocab-chunk index (last / "arbitrary" axis)

        @pl.when(j == 0)
        def _init():
            m_sc[...] = jnp.full_like(m_sc, -jnp.inf)
            l_sc[...] = jnp.zeros_like(l_sc)
            xl_sc[...] = jnp.zeros_like(xl_sc)

        lab = labels_ref[...]                              # (TM, 1) int32
        # f32 upcast of the chunk: bf16 accuracy; free once HBM-bound.
        x = logits_ref[...].astype(jnp.float32)            # (TM, CHUNK)

        col = jax.lax.broadcasted_iota(jnp.int32, x.shape, 1) + j * chunk
        if mask_cols:
            # columns past V (ragged last chunk) contribute nothing
            x = jnp.where(col < v_total, x, -jnp.inf)

        # ---- online log-sum-exp update ----
        m_prev = m_sc[...]
        m_new = jnp.maximum(m_prev, jnp.max(x, axis=-1, keepdims=True))
        l_sc[...] = (l_sc[...] * jnp.exp(m_prev - m_new)
                     + jnp.sum(jnp.exp(x - m_new), axis=-1, keepdims=True))
        m_sc[...] = m_new

        # ---- label-logit gather: the label lands in exactly one chunk ----
        xl_sc[...] += jnp.sum(jnp.where(col == lab, x, 0.0),
                              axis=-1, keepdims=True)

        @pl.when(j == num_chunks - 1)
        def _finalize():
            valid = lab != IGNORE_INDEX                              # (TM, 1)
            nll = jnp.log(l_sc[...]) + m_sc[...] - xl_sc[...]        # (TM, 1) f32
            # select-style masking: ignored / padded / garbage rows -> exact 0
            out_ref[...] = jnp.sum(jnp.where(valid, nll, 0.0),
                                   axis=0, keepdims=True)            # (1, 1)

    return kernel


def _vmem_budget():
    """Generation-aware VMEM sizing (safe on v5e / v6e / v7x)."""
    try:
        cap = int(pltpu.get_tpu_info().vmem_capacity_bytes)
    except Exception:
        cap = 64 * 1024 * 1024          # conservative fallback (v7x per-TC)
    vmem_limit = max(32 * 1024 * 1024, min(cap // 2, 64 * 1024 * 1024))
    tile_budget = vmem_limit // 2       # input double-buffer + chunk-sized temps
    return tile_budget, vmem_limit


def _pick_tiles(n_rows: int, vocab: int, itemsize: int, tile_budget: int):
    """Row tile (multiple of the sublane pack) and lane chunk (<=2048, 128-mult)."""
    pack = 8 if itemsize >= 4 else (16 if itemsize == 2 else 32)
    chunk = vocab if vocab <= 2048 else 2048          # full dim or a 128-multiple
    # per (row, lane) element: 2x double-buffered input + f32/i32 chunk temporaries
    per_elem = 2 * itemsize + 24
    tm = tile_budget // (chunk * per_elem)
    tm = max(pack, (tm // pack) * pack)
    n_cap = ((n_rows + pack - 1) // pack) * pack      # no point exceeding the problem
    tm = min(tm, max(pack, n_cap))
    return int(tm), int(chunk)


@jax.jit
def gpt_lm_loss(logits, labels):
    """logits: (B, S, V) float; labels: (B, S) int -> scalar mean CE loss."""
    B, S, V = logits.shape
    N = B * S

    # zero-copy reshape; NO shift-slice copy of the big logits tensor.
    flat_logits = logits.reshape(N, V)

    # causal shift on the labels only (tiny copy): row (b, t) is scored against
    # labels[b, t+1]; the last position of every sequence is ignored.
    shift_labels = jnp.concatenate(
        [labels[:, 1:].astype(jnp.int32),
         jnp.full((B, 1), IGNORE_INDEX, jnp.int32)],
        axis=1,
    ).reshape(N)

    tile_budget, vmem_limit = _vmem_budget()
    tm, chunk = _pick_tiles(N, V, jnp.dtype(logits.dtype).itemsize, tile_budget)
    num_tiles = pl.cdiv(N, tm)
    num_chunks = pl.cdiv(V, chunk)
    Np = num_tiles * tm

    # pad ONLY the labels (int32, tiny); padded rows are ignored in-kernel.
    pad = Np - N
    labels_padded = shift_labels
    if pad:
        labels_padded = jnp.concatenate(
            [shift_labels, jnp.full((pad,), IGNORE_INDEX, jnp.int32)])
    labels_2d = labels_padded.reshape(Np, 1)

    kernel = _make_ce_kernel(V, chunk, num_chunks)

    per_tile_nll = pl.pallas_call(
        kernel,
        out_shape=jax.ShapeDtypeStruct((num_tiles, 1), jnp.float32),
        grid_spec=pltpu.PrefetchScalarGridSpec(
            num_scalar_prefetch=0,
            grid=(num_tiles, num_chunks),
            in_specs=[
                pl.BlockSpec((tm, chunk), lambda i, j: (i, j)),   # logits chunk
                pl.BlockSpec((tm, 1), lambda i, j: (i, 0)),       # labels (per row tile)
            ],
            out_specs=pl.BlockSpec((1, 1), lambda i, j: (i, 0)),
            scratch_shapes=[pltpu.VMEM((tm, 1), jnp.float32),     # running max
                            pltpu.VMEM((tm, 1), jnp.float32),     # running sumexp
                            pltpu.VMEM((tm, 1), jnp.float32)],    # label logit
        ),
        compiler_params=pltpu.CompilerParams(
            dimension_semantics=("parallel", "arbitrary"),
            vmem_limit_bytes=vmem_limit),
    )(flat_logits, labels_2d)

    denom = jnp.sum((shift_labels != IGNORE_INDEX).astype(jnp.float32))
    # 0/0 -> NaN when there are no valid tokens (matches PyTorch reduction='mean')
    return (jnp.sum(per_tile_nll) / denom).astype(jnp.float32)


def _reference_loss(logits, labels):
    """Pure-JAX reference of GPTLMLoss.forward for verification."""
    V = logits.shape[-1]
    sl = logits[:, :-1, :].reshape(-1, V).astype(jnp.float32)
    sb = labels[:, 1:].reshape(-1)
    valid = sb != IGNORE_INDEX
    safe = jnp.where(valid, sb, 0)
    logp = jax.nn.log_softmax(sl, axis=-1)
    nll = -jnp.take_along_axis(logp, safe[:, None], axis=-1)[:, 0]
    nll = jnp.where(valid, nll, 0.0)
    return jnp.sum(nll) / jnp.sum(valid.astype(jnp.float32))


if __name__ == "__main__":
    key = jax.random.PRNGKey(0)

    # --- test 1: small shapes (single vocab chunk) ---
    B, S, V = 2, 9, 32
    k1, k2, k3, k4 = jax.random.split(key, 4)
    logits = jax.random.normal(k1, (B, S, V), dtype=jnp.float32)
    labels = jax.random.randint(k2, (B, S), 0, V, dtype=jnp.int32)
    ignore_mask = jax.random.bernoulli(k3, p=0.2, shape=(B, S))
    labels = jnp.where(ignore_mask, IGNORE_INDEX, labels)

    loss = gpt_lm_loss(logits, labels)
    jax.block_until_ready(loss)
    ref = _reference_loss(logits, labels)
    assert jnp.allclose(loss, ref, atol=1e-5, rtol=1e-5), (loss, ref)

    # --- test 2: vocab larger than one chunk (exercises online LSE + column mask) ---
    B2, S2, V2 = 2, 9, 2176   # 2176 > 2048 -> two chunks, ragged last chunk
    k5, k6, k7 = jax.random.split(k4, 3)
    logits2 = jax.random.normal(k5, (B2, S2, V2), dtype=jnp.float32)
    labels2 = jax.random.randint(k6, (B2, S2), 0, V2, dtype=jnp.int32)
    ignore_mask2 = jax.random.bernoulli(k7, p=0.2, shape=(B2, S2))
    labels2 = jnp.where(ignore_mask2, IGNORE_INDEX, labels2)

    loss2 = gpt_lm_loss(logits2, labels2)
    jax.block_until_ready(loss2)
    ref2 = _reference_loss(logits2, labels2)
    assert jnp.allclose(loss2, ref2, atol=1e-5, rtol=1e-5), (loss2, ref2)

    print("KERNEL_OK")
</pallas_src>

<mosaic_0001>
module attributes {stable_mosaic.version = 11 : i64} {
  func.func @kernel(%arg0: i32, %arg1: i32, %arg2: memref<24x32xf32, #tpu.memory_space<vmem>>, %arg3: memref<24x1xi32, #tpu.memory_space<vmem>>, %arg4: memref<1x1xf32, #tpu.memory_space<vmem>>, %arg5: memref<24x1xf32, #tpu.memory_space<vmem>>, %arg6: memref<24x1xf32, #tpu.memory_space<vmem>>, %arg7: memref<24x1xf32, #tpu.memory_space<vmem>>) attributes {dimension_semantics = [#tpu.dimension_semantics<parallel>, #tpu.dimension_semantics<arbitrary>], iteration_bounds = array<i64: 1, 1>, scalar_prefetch = 0 : i64, scratch_operands = 3 : i64, tpu.core_type = #tpu.core_type<tc>, window_params = [{transform_indices = @transform_0, window_bounds = array<i64: 24, 32>}, {transform_indices = @transform_1, window_bounds = array<i64: 24, 1>}, {transform_indices = @transform_2, window_bounds = array<i64: 1, 1>}]} {
    %c0_i32 = arith.constant 0 : i32
    %0 = arith.cmpi eq, %arg1, %c0_i32 : i32
    %1 = arith.extui %0 : i1 to i32
    %c0_i32_0 = arith.constant 0 : i32
    %2 = arith.cmpi ne, %1, %c0_i32_0 : i32
    scf.if %2 {
      %cst_21 = arith.constant 0xFF800000 : f32
      %37 = vector.broadcast %cst_21 : f32 to vector<24x1xf32>
      %c0_22 = arith.constant 0 : index
      %c0_23 = arith.constant 0 : index
      %38 = vector.load %arg5[%c0_22, %c0_23] : memref<24x1xf32, #tpu.memory_space<vmem>>, vector<24x1xf32>
      tpu.vector_store %arg5[%c0_22, %c0_23], %37 {strides = array<i32>} : memref<24x1xf32, #tpu.memory_space<vmem>>, vector<24x1xf32>,
      %cst_24 = arith.constant 0.000000e+00 : f32
      %39 = vector.broadcast %cst_24 : f32 to vector<24x1xf32>
      %c0_25 = arith.constant 0 : index
      %c0_26 = arith.constant 0 : index
      %40 = vector.load %arg6[%c0_25, %c0_26] : memref<24x1xf32, #tpu.memory_space<vmem>>, vector<24x1xf32>
      tpu.vector_store %arg6[%c0_25, %c0_26], %39 {strides = array<i32>} : memref<24x1xf32, #tpu.memory_space<vmem>>, vector<24x1xf32>,
      %cst_27 = arith.constant 0.000000e+00 : f32
      %41 = vector.broadcast %cst_27 : f32 to vector<24x1xf32>
      %c0_28 = arith.constant 0 : index
      %c0_29 = arith.constant 0 : index
      %42 = vector.load %arg7[%c0_28, %c0_29] : memref<24x1xf32, #tpu.memory_space<vmem>>, vector<24x1xf32>
      tpu.vector_store %arg7[%c0_28, %c0_29], %41 {strides = array<i32>} : memref<24x1xf32, #tpu.memory_space<vmem>>, vector<24x1xf32>,
    } else {
    }
    %c0 = arith.constant 0 : index
    %c0_1 = arith.constant 0 : index
    %3 = vector.load %arg3[%c0, %c0_1] : memref<24x1xi32, #tpu.memory_space<vmem>>, vector<24x1xi32>
    %c0_2 = arith.constant 0 : index
    %c0_3 = arith.constant 0 : index
    %4 = vector.load %arg2[%c0_2, %c0_3] : memref<24x32xf32, #tpu.memory_space<vmem>>, vector<24x32xf32>
    %5 = tpu.iota {dimensions = array<i32: 1>} : vector<24x32xi32>
    %c32_i32 = arith.constant 32 : i32
    %6 = arith.muli %arg1, %c32_i32 : i32
    %7 = vector.broadcast %6 : i32 to vector<24x32xi32>
    %8 = arith.addi %5, %7 : vector<24x32xi32>
    %c0_4 = arith.constant 0 : index
    %c0_5 = arith.constant 0 : index
    %9 = vector.load %arg5[%c0_4, %c0_5] : memref<24x1xf32, #tpu.memory_space<vmem>>, vector<24x1xf32>
    %cst = arith.constant dense<0xFF800000> : vector<24xf32>
    %10 = vector.multi_reduction <maximumf>, %4, %cst [1] : vector<24x32xf32> to vector<24xf32>
    %11 = vector.shape_cast %10 : vector<24xf32> to vector<24x1xf32>
    %12 = arith.maximumf %9, %11 : vector<24x1xf32>
    %c0_6 = arith.constant 0 : index
    %c0_7 = arith.constant 0 : index
    %13 = vector.load %arg6[%c0_6, %c0_7] : memref<24x1xf32, #tpu.memory_space<vmem>>, vector<24x1xf32>
    %14 = arith.subf %9, %12 : vector<24x1xf32>
    %15 = math.exp %14 : vector<24x1xf32>
    %16 = arith.mulf %13, %15 : vector<24x1xf32>
    %17 = vector.broadcast %12 : vector<24x1xf32> to vector<24x32xf32>
    %18 = arith.subf %4, %17 : vector<24x32xf32>
    %19 = math.exp %18 : vector<24x32xf32>
    %cst_8 = arith.constant dense<0.000000e+00> : vector<24xf32>
    %20 = vector.multi_reduction <add>, %19, %cst_8 [1] : vector<24x32xf32> to vector<24xf32>
    %21 = vector.shape_cast %20 : vector<24xf32> to vector<24x1xf32>
    %22 = arith.addf %16, %21 : vector<24x1xf32>
    %c0_9 = arith.constant 0 : index
    %c0_10 = arith.constant 0 : index
    %23 = vector.load %arg6[%c0_9, %c0_10] : memref<24x1xf32, #tpu.memory_space<vmem>>, vector<24x1xf32>
    tpu.vector_store %arg6[%c0_9, %c0_10], %22 {strides = array<i32>} : memref<24x1xf32, #tpu.memory_space<vmem>>, vector<24x1xf32>,
    %c0_11 = arith.constant 0 : index
    %c0_12 = arith.constant 0 : index
    %24 = vector.load %arg5[%c0_11, %c0_12] : memref<24x1xf32, #tpu.memory_space<vmem>>, vector<24x1xf32>
    tpu.vector_store %arg5[%c0_11, %c0_12], %12 {strides = array<i32>} : memref<24x1xf32, #tpu.memory_space<vmem>>, vector<24x1xf32>,
    %c0_13 = arith.constant 0 : index
    %c0_14 = arith.constant 0 : index
    %25 = vector.load %arg7[%c0_13, %c0_14] : memref<24x1xf32, #tpu.memory_space<vmem>>, vector<24x1xf32>
    %26 = vector.broadcast %3 : vector<24x1xi32> to vector<24x32xi32>
    %27 = arith.cmpi eq, %8, %26 : vector<24x32xi32>
    %cst_15 = arith.constant 0.000000e+00 : f32
    %28 = vector.broadcast %cst_15 : f32 to vector<24x32xf32>
    %29 = arith.select %27, %4, %28 : vector<24x32xi1>, vector<24x32xf32>
    %cst_16 = arith.constant dense<0.000000e+00> : vector<24xf32>
    %30 = vector.multi_reduction <add>, %29, %cst_16 [1] : vector<24x32xf32> to vector<24xf32>
    %31 = vector.shape_cast %30 : vector<24xf32> to vector<24x1xf32>
    %32 = arith.addf %25, %31 : vector<24x1xf32>
    %c0_17 = arith.constant 0 : index
    %c0_18 = arith.constant 0 : index
    %33 = vector.load %arg7[%c0_17, %c0_18] : memref<24x1xf32, #tpu.memory_space<vmem>>, vector<24x1xf32>
    tpu.vector_store %arg7[%c0_17, %c0_18], %32 {strides = array<i32>} : memref<24x1xf32, #tpu.memory_space<vmem>>, vector<24x1xf32>,
    %c0_i32_19 = arith.constant 0 : i32
    %34 = arith.cmpi eq, %arg1, %c0_i32_19 : i32
    %35 = arith.extui %34 : i1 to i32
    %c0_i32_20 = arith.constant 0 : i32
    %36 = arith.cmpi ne, %35, %c0_i32_20 : i32
    scf.if %36 {
      %c-100_i32 = arith.constant -100 : i32
      %37 = vector.broadcast %c-100_i32 : i32 to vector<24x1xi32>
      %38 = arith.cmpi ne, %3, %37 : vector<24x1xi32>
      %c0_21 = arith.constant 0 : index
      %c0_22 = arith.constant 0 : index
      %39 = vector.load %arg6[%c0_21, %c0_22] : memref<24x1xf32, #tpu.memory_space<vmem>>, vector<24x1xf32>
      %40 = math.log %39 : vector<24x1xf32>
      %c0_23 = arith.constant 0 : index
      %c0_24 = arith.constant 0 : index
      %41 = vector.load %arg5[%c0_23, %c0_24] : memref<24x1xf32, #tpu.memory_space<vmem>>, vector<24x1xf32>
      %42 = arith.addf %40, %41 : vector<24x1xf32>
      %c0_25 = arith.constant 0 : index
      %c0_26 = arith.constant 0 : index
      %43 = vector.load %arg7[%c0_25, %c0_26] : memref<24x1xf32, #tpu.memory_space<vmem>>, vector<24x1xf32>
      %44 = arith.subf %42, %43 : vector<24x1xf32>
      %cst_27 = arith.constant 0.000000e+00 : f32
      %45 = vector.broadcast %cst_27 : f32 to vector<24x1xf32>
      %46 = arith.select %38, %44, %45 : vector<24x1xi1>, vector<24x1xf32>
      %cst_28 = arith.constant dense<0.000000e+00> : vector<1xf32>
      %47 = vector.multi_reduction <add>, %46, %cst_28 [0] : vector<24x1xf32> to vector<1xf32>
      %48 = vector.shape_cast %47 : vector<1xf32> to vector<1x1xf32>
      %c0_29 = arith.constant 0 : index
      %c0_30 = arith.constant 0 : index
      %49 = vector.load %arg4[%c0_29, %c0_30] : memref<1x1xf32, #tpu.memory_space<vmem>>, vector<1x1xf32>
      tpu.vector_store %arg4[%c0_29, %c0_30], %48 {strides = array<i32>} : memref<1x1xf32, #tpu.memory_space<vmem>>, vector<1x1xf32>,
    } else {
    }
    return
  }
  func.func @transform_0(%arg0: i32, %arg1: i32) -> (i32, i32) {
    %c0_i32 = arith.constant 0 : i32
    return %arg0, %arg1 : i32, i32
  }
  func.func @transform_1(%arg0: i32, %arg1: i32) -> (i32, i32) {
    %c0_i32 = arith.constant 0 : i32
    %c0_i32_0 = arith.constant 0 : i32
    return %arg0, %c0_i32 : i32, i32
  }
  func.func @transform_2(%arg0: i32, %arg1: i32) -> (i32, i32) {
    %c0_i32 = arith.constant 0 : i32
    %c0_i32_0 = arith.constant 0 : i32
    return %arg0, %c0_i32 : i32, i32
  }
}

</mosaic_0001>

<bundles_post_ra>
// kernel: gpt_lm_loss.1
= control target key start
LH: loop header
LB: loop body
LE: loop exit
PB: predicated region body
PF: predicated region fallthrough
CT: control target
= control target key end

     0   :  { %vm40_vm0 = vcmask 261120   ;;  %s359_s0 = inlined_call_operand.vmem [shape: f32[18,32], index: 0, kind: input, shape index: {}]   ;;  %s360_s1 = inlined_call_operand.vmem [shape: s32[24,1], index: 1, kind: input, shape index: {}]   ;;  %s361_s2 = inlined_call_operand.hbm [shape: f32[1,1], index: 2, kind: output, shape index: {}]  }
   0x1   :  { %v271_v0 = vld [vmem:[%s359_s0] sm:$0xff]  ;;  %v276_v1 = vld [vmem:[%s359_s0 + $0x10] sm:$0xff]  ;;  %v281_v2 = vld [vmem:[%s359_s0 + $0x8] sm:$0xff] }
   0x2   :  { %v41_v3 = vsel %vm40_vm0, %v271_v0, -inf  ;;  %v47_v4 = vsel %vm40_vm0, %v276_v1, -inf }
   0x3   :  { %7 = vsyncpa [#allocation6], 0  ;;  %42 = vmax.xlane.f32.xlu0 %v41_v3  ;;  %48 = vmax.xlane.f32.xlu1 %v47_v4  ;;  %v44_v5 = vsel %vm40_vm0, %v281_v2, -inf  ;;  %vm16_vm1 = vcmask 7168   ;;  %v249_v6 = vmov -inf   ;;  %v250_v7 = vmov 0  }
   0x4   :  { %17 = vst.msk [vmem:[#allocation2] sm:$0xff] %vm16_vm1, %v249_v6  ;;  %18 = vst.msk [vmem:[#allocation2 + $0x8] sm:$0xff] %vm16_vm1, %v249_v6  ;;  %205 = vset.pattern.permute.xlu1 %v250_v7  ;;  %206 = vset.pattern.permute.xlu0 %v250_v7  ;;  %v251_v8 = vmov 0.0   ;;  %v308_v21 = vld [vmem:[%s360_s1] sm:$0xff]  ;;  %v314_v22 = vld [vmem:[%s360_s1 + $0x8] sm:$0xff]  ;;  %v32_v34 = vlaneseq  ;;  %vm185_vm8 = vcmask 0  }
   0x5   :  { %19 = vst.msk [vmem:[#allocation2 + $0x10] sm:$0xff] %vm16_vm1, %v249_v6  ;;  %20 = vst.msk [vmem:[#allocation3] sm:$0xff] %vm16_vm1, %v251_v8  ;;  %v320_v23 = vld [vmem:[%s360_s1 + $0x10] sm:$0xff]  ;;  %vm147_vm5 = vcmp.ne.s32.totalorder %v308_v21, 4294967196  ;;  %vm148_vm6 = vcmp.ne.s32.totalorder %v314_v22, 4294967196  ;;  %s252_s1 = smov [#allocation5]  }
   0x6   :  { %21 = vst.msk [vmem:[#allocation3 + $0x8] sm:$0xff] %vm16_vm1, %v251_v8  ;;  %22 = vst.msk [vmem:[#allocation3 + $0x10] sm:$0xff] %vm16_vm1, %v251_v8  ;;  %v33_v37 = vand.u32 127, %v32_v34  ;;  %vm149_vm7 = vcmp.ne.s32.totalorder %v320_v23, 4294967196  ;;  %s193_s20 = sshll.u32 %s252_s1, 4  ;;  %s194_s20 = int_to_ptr.vmem [resolvable:$true] %s193_s20 }
   0x7   :  { %45 = vmax.xlane.f32.xlu0 %v44_v5  ;;  %23 = vst.msk [vmem:[#allocation4] sm:$0xff] %vm16_vm1, %v251_v8  ;;  %24 = vst.msk [vmem:[#allocation4 + $0x8] sm:$0xff] %vm16_vm1, %v251_v8  ;;  %s225_s21 = scalar_lea.vmem %s194_s20, 16  ;;  %s229_s22 = scalar_lea.vmem %s194_s20, 32 }
   0x8   :  { %25 = vst.msk [vmem:[#allocation4 + $0x10] sm:$0xff] %vm16_vm1, %v251_v8  ;;  %p226_p0 = scmp.ne.s32.totalorder %s194_s20, %s225_s21  ;;  %p230_p1 = scmp.lt.s32.totalorder %s194_s20, %s194_s20 }
   0x9   :  { %p231_p2 = scmp.lt.s32.totalorder %s229_s22, %s225_s21 }
   0xb   :  { %v37_v9 = vld [vmem:[#allocation2] sm:$0xff]  ;;  %v38_v15 = vld [vmem:[#allocation2 + $0x8] sm:$0xff]  ;;  %p232_p3 = por %p231_p2, %p230_p1 }
   0xc   :  { %v298_v10 = vld [vmem:[#allocation2 + $0x10] sm:$0xff]  ;;  %v53_v54 = vld [vmem:[#allocation3] sm:$0xff] }
   0xd   :  { %v54_v58 = vld [vmem:[#allocation3 + $0x8] sm:$0xff]  ;;  %v55_v61 = vld [vmem:[#allocation3 + $0x10] sm:$0xff]  ;;  %p233_p4 = pnand %p232_p3, %p226_p0 }
   0xe   :  { %v111_v5 = vld [vmem:[#allocation4] sm:$0xff] }
   0xf   :  { %v113_v4 = vld [vmem:[#allocation4 + $0x10] sm:$0xff] }
  0x90   :  { %v43_v11 = vpop.xlane.xlu0 %42  ;;  %v49_v12 = vpop.xlane.xlu1 %48 }
  0x91   :  { %v50_v13 = vmax.f32 %v37_v9, %v43_v11  ;;  %v52_v14 = vmax.f32 %v298_v10, %v49_v12  ;;  %v112_v11 = vld [vmem:[#allocation4 + $0x8] sm:$0xff] }
  0x93   :  { %v56_v16 = vsub.f32 %v37_v9, %v50_v13  ;;  %108 = vst.msk [vmem:[#allocation2] sm:$0xff] %vm16_vm1, %v50_v13  ;;  %70 = vperm.xlu1 %205, %v50_v13   ;;  %v58_v17 = vsub.f32 %v298_v10, %v52_v14  ;;  %110 = vst.msk [vmem:[#allocation2 + $0x10] sm:$0xff] %vm16_vm1, %v52_v14 }
  0x94   :  { %v46_v18 = vpop.xlane.xlu0 %45 }
  0x95   :  { %v51_v19 = vmax.f32 %v38_v15, %v46_v18  ;;  %v59_v50 = vmul.f32 1.442695, %v56_v16  ;;  %v63_v52 = vmul.f32 1.442695, %v58_v17 }
  0x97   :  { %v57_v20 = vsub.f32 %v38_v15, %v51_v19  ;;  %109 = vst.msk [vmem:[#allocation2 + $0x8] sm:$0xff] %vm16_vm1, %v51_v19  ;;  %75 = vperm.xlu0 %206, %v51_v19   ;;  %80 = vperm.xlu1 %205, %v52_v14  }
  0x99   :  { %v61_v51 = vmul.f32 1.442695, %v57_v20 }
  0x9a   :  { %v159_v18 = vld [vmem:[#allocation2] sm:$0xff] }
  0x9b   :  { %115 = vperm.xlu1 %205, %v308_v21  }
  0x9f   :  { %118 = vperm.xlu1 %205, %v314_v22  }
  0xa3   :  { %121 = vperm.xlu1 %205, %v320_v23  }
 0x112   :  { %v71_v24 = vpop.permute.xlu1 %70 }
 0x113   :  { %v83_v25 = vsub.f32 %v271_v0, %v71_v24 }
 0x115   :  { %v86_v26 = vmul.f32 1.442695, %v83_v25 }
 0x116   :  { %v76_v27 = vpop.permute.xlu0 %75  ;;  %v81_v28 = vpop.permute.xlu1 %80 }
 0x117   :  { %207 = vpow2.f32 %v86_v26  ;;  %v84_v29 = vsub.f32 %v281_v2, %v76_v27  ;;  %v85_v30 = vsub.f32 %v276_v1, %v81_v28 }
 0x119   :  { %v88_v31 = vmul.f32 1.442695, %v84_v29  ;;  %v90_v32 = vmul.f32 1.442695, %v85_v30  ;;  %v160_v29 = vld [vmem:[#allocation2 + $0x8] sm:$0xff]  ;;  %v161_v30 = vld [vmem:[#allocation2 + $0x10] sm:$0xff] }
 0x11a   :  { %v116_v33 = vpop.permute.xlu1 %115 }
 0x11b   :  { %209 = vpow2.f32 %v88_v31  ;;  %vm123_vm3 = vcmp.eq.s32.totalorder %v33_v37, %v116_v33 }
 0x11c   :  { %211 = vpow2.f32 %v90_v32  ;;  %v126_v45 = vsel %vm123_vm3, %v271_v0, 0.0 }
 0x11d   :  { %v129_v47 = vsel %vm40_vm0, %v126_v45, 0.0  ;;  %213 = vpow2.f32 %v59_v50 }
 0x11e   :  { %v119_v35 = vpop.permute.xlu1 %118  ;;  %215 = vpow2.f32 %v61_v51 }
 0x11f   :  { %vm124_vm4 = vcmp.eq.s32.totalorder %v33_v37, %v119_v35  ;;  %217 = vpow2.f32 %v63_v52 }
 0x120   :  { %v127_v48 = vsel %vm124_vm4, %v281_v2, 0.0 }
 0x121   :  { %v208_v36 = vpop.eup %207  ;;  %v132_v49 = vsel %vm40_vm0, %v127_v48, 0.0 }
 0x122   :  { %v122_v38 = vpop.permute.xlu1 %121  ;;  %v92_v39 = vsel %vm40_vm0, %v208_v36, 0.0 }
 0x123   :  { %93 = vadd.xlane.f32.xlu1 %v92_v39  ;;  %vm125_vm2 = vcmp.eq.s32.totalorder %v33_v37, %v122_v38 }
 0x124   :  { %v128_v44 = vsel %vm125_vm2, %v276_v1, 0.0 }
 0x125   :  { %v210_v40 = vpop.eup %209  ;;  %v135_v46 = vsel %vm40_vm0, %v128_v44, 0.0 }
 0x126   :  { %v212_v41 = vpop.eup %211  ;;  %v95_v42 = vsel %vm40_vm0, %v210_v40, 0.0 }
 0x127   :  { %96 = vadd.xlane.f32.xlu0 %v95_v42  ;;  %v98_v43 = vsel %vm40_vm0, %v212_v41, 0.0  ;;  %v214_v53 = vpop.eup %213 }
 0x128   :  { %99 = vadd.xlane.f32.xlu1 %v98_v43  ;;  %v65_v55 = vmul.f32 %v214_v53, %v53_v54  ;;  %v216_v56 = vpop.eup %215 }
 0x129   :  { %v218_v59 = vpop.eup %217  ;;  %v66_v62 = vmul.f32 %v216_v56, %v54_v58 }
 0x12a   :  { %v67_v0 = vmul.f32 %v218_v59, %v55_v61 }
 0x12b   :  { %136 = vadd.xlane.f32.xlu0 %v135_v46 }
 0x12c   :  { %130 = vadd.xlane.f32.xlu1 %v129_v47 }
 0x130   :  { %133 = vadd.xlane.f32.xlu1 %v132_v49 }
 0x1b0   :  { %v94_v57 = vpop.xlane.xlu1 %93 }
 0x1b1   :  { %v101_v60 = vadd.f32 %v94_v57, %v65_v55 }
 0x1b3   :  { %105 = vst.msk [vmem:[#allocation3] sm:$0xff] %vm16_vm1, %v101_v60 }
 0x1b4   :  { %v97_v63 = vpop.xlane.xlu0 %96 }
 0x1b5   :  { %v102_v1 = vadd.f32 %v97_v63, %v66_v62  ;;  %v100_v2 = vpop.xlane.xlu1 %99 }
 0x1b6   :  { %v103_v3 = vadd.f32 %v100_v2, %v67_v0 }
 0x1b7   :  { %106 = vst.msk [vmem:[#allocation3 + $0x8] sm:$0xff] %vm16_vm1, %v102_v1 }
 0x1b8   :  { %107 = vst.msk [vmem:[#allocation3 + $0x10] sm:$0xff] %vm16_vm1, %v103_v3  ;;  %v137_v6 = vpop.xlane.xlu0 %136 }
 0x1b9   :  { %v140_v7 = vadd.f32 %v137_v6, %v113_v4  ;;  %v131_v8 = vpop.xlane.xlu1 %130 }
 0x1ba   :  { %v138_v9 = vadd.f32 %v131_v8, %v111_v5  ;;  %v150_v10 = vld [vmem:[#allocation3] sm:$0xff] }
 0x1bb   :  { %143 = vst.msk [vmem:[#allocation4 + $0x10] sm:$0xff] %vm16_vm1, %v140_v7  ;;  %219 = vlog2.f32 %v150_v10 }
 0x1bc   :  { %141 = vst.msk [vmem:[#allocation4] sm:$0xff] %vm16_vm1, %v138_v9 }
 0x1bd   :  { %v134_v12 = vpop.xlane.xlu1 %133 }
 0x1be   :  { %v139_v13 = vadd.f32 %v134_v12, %v112_v11  ;;  %v151_v14 = vld [vmem:[#allocation3 + $0x8] sm:$0xff] }
 0x1bf   :  { %v152_v15 = vld [vmem:[#allocation3 + $0x10] sm:$0xff]  ;;  %221 = vlog2.f32 %v151_v14 }
 0x1c0   :  { %142 = vst.msk [vmem:[#allocation4 + $0x8] sm:$0xff] %vm16_vm1, %v139_v13  ;;  %223 = vlog2.f32 %v152_v15 }
 0x1c2   :  { %v167_v34 = vld [vmem:[#allocation4 + $0x10] sm:$0xff] }
 0x1c3   :  { %v165_v24 = vld [vmem:[#allocation4] sm:$0xff] }
 0x1c5   :  { %v220_v16 = vpop.eup %219 }
 0x1c6   :  { %v154_v17 = vmul.f32 0.6931472, %v220_v16 }
 0x1c7   :  { %v166_v33 = vld [vmem:[#allocation4 + $0x8] sm:$0xff] }
 0x1c8   :  { %v162_v19 = vadd.f32 %v159_v18, %v154_v17 }
 0x1c9   :  { %v222_v20 = vpop.eup %221 }
 0x1ca   :  { %v224_v25 = vpop.eup %223  ;;  %v156_v26 = vmul.f32 0.6931472, %v222_v20  ;;  %v168_v27 = vsub.f32 %v162_v19, %v165_v24 }
 0x1cb   :  { %v158_v28 = vmul.f32 0.6931472, %v224_v25 }
 0x1cc   :  { %v163_v31 = vadd.f32 %v160_v29, %v156_v26  ;;  %v171_v36 = vsel %vm147_vm5, %v168_v27, 0.0 }
 0x1cd   :  { %v164_v32 = vadd.f32 %v161_v30, %v158_v28  ;;  %v174_v40 = vsel %vm16_vm1, %v171_v36, 0.0 }
 0x1ce   :  { %v169_v35 = vsub.f32 %v163_v31, %v166_v33 }
 0x1cf   :  { %v170_v37 = vsub.f32 %v164_v32, %v167_v34 }
 0x1d0   :  { %v172_v38 = vsel %vm148_vm6, %v169_v35, 0.0 }
 0x1d1   :  { %v173_v39 = vsel %vm149_vm7, %v170_v37, 0.0  ;;  %v175_v21 = vsel %vm16_vm1, %v172_v38, 0.0 }
 0x1d2   :  { %v176_v41 = vadd.f32 %v175_v21, %v174_v40  ;;  %v177_v42 = vsel %vm16_vm1, %v173_v39, 0.0 }
 0x1d4   :  { %v178_v43 = vadd.f32 %v177_v42, %v176_v41 }
 0x1d6   :  { %v179_v44 = vrot.slane %v178_v43, 4 }
 0x1d8   :  { %v180_v22 = vadd.f32 %v179_v44, %v178_v43 }
 0x1da   :  { %v181_v45 = vrot.slane %v180_v22, 2 }
 0x1dc   :  { %v182_v46 = vadd.f32 %v181_v45, %v180_v22 }
 0x1de   :  { %v183_v23 = vrot.slane %v182_v46, 1 }
 0x1e0   :  { %v184_v47 = vadd.f32 %v183_v23, %v182_v46 }
 0x1e2   :  { %186 = vst.msk [vmem:[#allocation5] sm:$0x1] %vm185_vm8, %v184_v47 }
 0x1e3   :  { %236 = shalt.err (!%p233_p4)
}
 0x1e4   :  { %s237_s25 = scalar_lea.hbm %s361_s2, 16 }
 0x1e5   :  { %p238_p5 = scmp.ne.s32.totalorder %s361_s2, %s237_s25  ;;  %p241_p6 = scmp.lt.u32.totalorder %s237_s25, %s361_s2 }
 0x1e7   :  { %p243_p7 = pnand %p241_p6, %p238_p5 }
 0x1e9   :  { %246 = shalt.err (!%p243_p7)
}
 0x1ea   :  { %196 = dma.vmem_to_hbm [thread:$0]  %s194_s20, 16, %s361_s2, [#allocation6]  }
 0x1eb   :  { %247 = dma.done.wait [#allocation6], 16  }
 0x1ec   :  { %248 = vsyncadd [#allocation6], 4294967280 }
 0x1ed   :  { %200 = vsyncpa [#allocation6], 1 }

</bundles_post_ra>
